<compile_context>
chip_gen: v7x
topology: tpu7x:2x2x1
jax: 0.10.0
libtpu: 0.0.40
codegen_flags: <defaults>
</compile_context>

<pallas_src>
import functools
import math

import jax
import jax.numpy as jnp
from jax.experimental import pallas as pl
from jax.experimental.pallas import tpu as pltpu


# ----------------------------------------------------------------------------
# helpers
# ----------------------------------------------------------------------------
def _round_up(x, m):
    return ((x + m - 1) // m) * m


def _row_tile(m, max_tm=256):
    # Row tile (second-to-last dim): multiple of 8 sublanes, capped at max_tm.
    return max_tm if m >= max_tm else _round_up(m, 8)


def _pad_rows(x2d, m_pad):
    m = x2d.shape[0]
    if m_pad == m:
        return x2d
    return jnp.pad(x2d, ((0, m_pad - m), (0, 0)))


# ----------------------------------------------------------------------------
# FFN kernel: y = relu(x @ w1.T + b1) @ w2.T + b2
#   grid = (M_tiles [parallel], dff_tiles [arbitrary reduction])
# ----------------------------------------------------------------------------
def _ffn_kernel(x_ref, w1_ref, b1_ref, w2_ref, b2_ref, o_ref, acc_ref):
    k = pl.program_id(1)

    @pl.when(k == 0)
    def _():
        acc_ref[...] = jnp.zeros_like(acc_ref)

    x = x_ref[...]
    # h = relu(x @ w1_chunk.T + b1_chunk)  -- w1 in torch (dff, d_model) layout.
    h = jax.lax.dot_general(
        x, w1_ref[...], (((1,), (1,)), ((), ())),
        preferred_element_type=jnp.float32)
    h = jnp.maximum(h + b1_ref[...], 0.0)
    # acc += h @ w2_chunk.T  -- w2 in torch (d_model, dff) layout, chunked on dff.
    # Cast h back to the input dtype so the MXU runs at bf16 rate for bf16 models.
    acc_ref[...] += jax.lax.dot_general(
        h.astype(x.dtype), w2_ref[...], (((1,), (1,)), ((), ())),
        preferred_element_type=jnp.float32)

    @pl.when(k == pl.num_programs(1) - 1)
    def _():
        o_ref[...] = (acc_ref[...] + b2_ref[...]).astype(o_ref.dtype)


def feed_forward_network(x, w1, b1, w2, b2, *, tm=256, tk_max=512):
    """x: [B, S, d_model]; w1: [dff, d_model]; b1: [dff]; w2: [d_model, dff]; b2: [d_model]."""
    batch, seq, d_model = x.shape
    dff = w1.shape[0]
    M = batch * seq

    TM = _row_tile(M, tm)
    Mp = _round_up(M, TM)
    # dff reduction tile: largest lane-aligned divisor of dff (<= tk_max),
    # falling back to the full dff for small/odd shapes (e.g. the toy demo).
    TK = dff
    for c in (tk_max, 256, 128):
        if c <= tk_max and dff % c == 0:
            TK = c
            break

    x2d = _pad_rows(x.reshape(M, d_model), Mp)
    b1_2d = b1.reshape(1, dff)
    b2_2d = b2.reshape(1, d_model)

    itemsize = jnp.dtype(x.dtype).itemsize
    # Per-step VMEM: double-buffered tiles + f32 accumulator (budget explicitly,
    # so the same tile config works on v7x's 64 MiB VMEM).
    vmem_est = (2 * TM * d_model * itemsize        # x tile
                + 2 * TK * d_model * itemsize      # w1 chunk
                + 2 * d_model * TK * itemsize      # w2 chunk
                + 2 * (TK + d_model) * itemsize    # biases
                + 2 * TM * d_model * itemsize      # out tile
                + TM * d_model * 4)                # f32 accumulator
    vmem_limit = int(min(64 * 1024 * 1024,
                         max(32 * 1024 * 1024, vmem_est + 8 * 1024 * 1024)))

    cost = pl.CostEstimate(
        flops=int(4 * M * d_model * dff),
        transcendentals=0,
        bytes_accessed=int(
            (2 * M * d_model + 2 * dff * d_model + dff + d_model) * itemsize),
    )

    out2d = pl.pallas_call(
        _ffn_kernel,
        out_shape=jax.ShapeDtypeStruct((Mp, d_model), x.dtype),
        grid_spec=pltpu.PrefetchScalarGridSpec(
            num_scalar_prefetch=0,
            grid=(Mp // TM, dff // TK),
            in_specs=[
                pl.BlockSpec((TM, d_model), lambda i, k: (i, 0)),
                pl.BlockSpec((TK, d_model), lambda i, k: (k, 0)),
                pl.BlockSpec((1, TK), lambda i, k: (0, k)),
                pl.BlockSpec((d_model, TK), lambda i, k: (0, k)),
                pl.BlockSpec((1, d_model), lambda i, k: (0, 0)),
            ],
            out_specs=pl.BlockSpec((TM, d_model), lambda i, k: (i, 0)),
            scratch_shapes=[pltpu.VMEM((TM, d_model), jnp.float32)],
        ),
        compiler_params=pltpu.CompilerParams(
            dimension_semantics=("parallel", "arbitrary"),
            vmem_limit_bytes=vmem_limit,
        ),
        cost_estimate=cost,
    )(x2d, w1, b1_2d, w2, b2_2d)

    return out2d[:M].reshape(batch, seq, d_model)


# ----------------------------------------------------------------------------
# Linear projection (no bias), torch weight layout: y = x @ W^T
# ----------------------------------------------------------------------------
def _linear_nobias_kernel(x_ref, w_ref, o_ref):
    o_ref[...] = jax.lax.dot_general(
        x_ref[...], w_ref[...], (((1,), (1,)), ((), ())),
        preferred_element_type=jnp.float32).astype(o_ref.dtype)


def _linear_nobias(x2d, w):
    """x2d: [M, d_in]; w: [d_out, d_in] (torch layout) -> [M, d_out]."""
    M, d_in = x2d.shape
    d_out = w.shape[0]
    TM = _row_tile(M)
    Mp = _round_up(M, TM)
    xp = _pad_rows(x2d, Mp)
    out = pl.pallas_call(
        _linear_nobias_kernel,
        out_shape=jax.ShapeDtypeStruct((Mp, d_out), x2d.dtype),
        grid_spec=pltpu.PrefetchScalarGridSpec(
            num_scalar_prefetch=0,
            grid=(Mp // TM,),
            in_specs=[
                pl.BlockSpec((TM, d_in), lambda i: (i, 0)),
                pl.BlockSpec((d_out, d_in), lambda i: (0, 0)),  # weight stays VMEM-resident
            ],
            out_specs=pl.BlockSpec((TM, d_out), lambda i: (i, 0)),
        ),
        compiler_params=pltpu.CompilerParams(
            dimension_semantics=("parallel",)),
    )(xp, w)
    return out[:M]


# ----------------------------------------------------------------------------
# Scaled dot-product attention, one (batch, head) per grid cell
# ----------------------------------------------------------------------------
def _attention_kernel(q_ref, k_ref, v_ref, m_ref, o_ref, *, scale):
    q = q_ref[...].astype(jnp.float32)               # (Sq, dk)
    k = k_ref[...].astype(jnp.float32)               # (Sk, dk)
    s = jax.lax.dot_general(
        q, k, (((1,), (1,)), ((), ())),
        preferred_element_type=jnp.float32) * scale  # (Sq, Sk)
    s = jnp.where(m_ref[...] > 0, s, -1e9)
    s_max = jnp.max(s, axis=-1, keepdims=True)
    p = jnp.exp(s - s_max)
    p = p / jnp.sum(p, axis=-1, keepdims=True)
    o_ref[...] = jax.lax.dot_general(
        p.astype(v_ref.dtype), v_ref[...], (((1,), (0,)), ((), ())),
        preferred_element_type=jnp.float32).astype(o_ref.dtype)


def _scaled_dot_product_attention(q, k, v, mask):
    """q: [B,H,Sq,dk]; k,v: [B,H,Sk,dk]; mask: [B,H,Sq,Sk] (1 = keep, 0 = masked)."""
    B, H, Sq, dk = q.shape
    Sk = k.shape[2]
    kern = functools.partial(_attention_kernel, scale=1.0 / math.sqrt(dk))
    return pl.pallas_call(
        kern,
        out_shape=jax.ShapeDtypeStruct((B, H, Sq, dk), q.dtype),
        grid_spec=pltpu.PrefetchScalarGridSpec(
            num_scalar_prefetch=0,
            grid=(B, H),
            in_specs=[
                pl.BlockSpec((None, None, Sq, dk), lambda b, h: (b, h, 0, 0)),
                pl.BlockSpec((None, None, Sk, dk), lambda b, h: (b, h, 0, 0)),
                pl.BlockSpec((None, None, Sk, dk), lambda b, h: (b, h, 0, 0)),
                pl.BlockSpec((None, None, Sq, Sk), lambda b, h: (b, h, 0, 0)),
            ],
            out_specs=pl.BlockSpec((None, None, Sq, dk), lambda b, h: (b, h, 0, 0)),
        ),
        compiler_params=pltpu.CompilerParams(
            dimension_semantics=("parallel", "parallel")),
    )(q, k, v, mask)


def multi_head_attention(x_q, x_kv, wq, wk, wv, wo, num_heads, mask=None):
    B, Sq, D = x_q.shape
    Sk = x_kv.shape[1]
    dk = D // num_heads

    def proj(x, w, S):
        y = _linear_nobias(x.reshape(B * S, D), w)
        return y.reshape(B, S, num_heads, dk).transpose(0, 2, 1, 3)

    q = proj(x_q, wq, Sq)
    k = proj(x_kv, wk, Sk)
    v = proj(x_kv, wv, Sk)

    if mask is None:
        mask_b = jnp.ones((B, num_heads, Sq, Sk), jnp.float32)
    else:
        mask_b = jnp.broadcast_to(mask, (B, num_heads, Sq, Sk)).astype(jnp.float32)

    attn = _scaled_dot_product_attention(q, k, v, mask_b)     # (B,H,Sq,dk)
    attn = attn.transpose(0, 2, 1, 3).reshape(B * Sq, D)
    return _linear_nobias(attn, wo).reshape(B, Sq, D)


# ----------------------------------------------------------------------------
# Residual add + LayerNorm (torch nn.LayerNorm, eps=1e-5)
# ----------------------------------------------------------------------------
def _add_layernorm_kernel(x_ref, r_ref, g_ref, b_ref, o_ref, *, eps):
    s = x_ref[...].astype(jnp.float32) + r_ref[...].astype(jnp.float32)
    mu = jnp.mean(s, axis=-1, keepdims=True)
    c = s - mu
    var = jnp.mean(c * c, axis=-1, keepdims=True)
    y = c * jax.lax.rsqrt(var + eps)
    o_ref[...] = (y * g_ref[...] + b_ref[...]).astype(o_ref.dtype)


def add_layernorm(x, residual, gamma, beta, eps=1e-5):
    B, S, D = x.shape
    M = B * S
    TM = _row_tile(M)
    Mp = _round_up(M, TM)
    x2d = _pad_rows(x.reshape(M, D), Mp)
    r2d = _pad_rows(residual.reshape(M, D), Mp)
    kern = functools.partial(_add_layernorm_kernel, eps=eps)
    out = pl.pallas_call(
        kern,
        out_shape=jax.ShapeDtypeStruct((Mp, D), x.dtype),
        grid_spec=pltpu.PrefetchScalarGridSpec(
            num_scalar_prefetch=0,
            grid=(Mp // TM,),
            in_specs=[
                pl.BlockSpec((TM, D), lambda i: (i, 0)),
                pl.BlockSpec((TM, D), lambda i: (i, 0)),
                pl.BlockSpec((1, D), lambda i: (0, 0)),
                pl.BlockSpec((1, D), lambda i: (0, 0)),
            ],
            out_specs=pl.BlockSpec((TM, D), lambda i: (i, 0)),
        ),
        compiler_params=pltpu.CompilerParams(
            dimension_semantics=("parallel",)),
    )(x2d, r2d, gamma.reshape(1, D), beta.reshape(1, D))
    return out[:M].reshape(B, S, D)


# ----------------------------------------------------------------------------
# DecoderLayer forward
# ----------------------------------------------------------------------------
def decoder_layer(x, enc_output, params, num_heads,
                  look_ahead_mask=None, padding_mask=None):
    # TODO(synk): nn.Dropout layers are identity here (eval / inference semantics).
    p = params
    attn1 = multi_head_attention(x, x, p["wq1"], p["wk1"], p["wv1"], p["wo1"],
                                 num_heads, look_ahead_mask)
    out1 = add_layernorm(x, attn1, p["ln1_g"], p["ln1_b"])
    attn2 = multi_head_attention(out1, enc_output, p["wq2"], p["wk2"], p["wv2"],
                                 p["wo2"], num_heads, padding_mask)
    out2 = add_layernorm(out1, attn2, p["ln2_g"], p["ln2_b"])
    ffn_out = feed_forward_network(out2, p["ffn_w1"], p["ffn_b1"],
                                   p["ffn_w2"], p["ffn_b2"])
    out3 = add_layernorm(out2, ffn_out, p["ln3_g"], p["ln3_b"])
    return out3


# ----------------------------------------------------------------------------
# Pure-JAX reference (mirrors the torch module, dropout = identity)
# ----------------------------------------------------------------------------
def _ref_mha(xq, xkv, wq, wk, wv, wo, num_heads, mask):
    B, Sq, D = xq.shape
    Sk = xkv.shape[1]
    dk = D // num_heads
    hp = jax.lax.Precision.HIGHEST
    Q = jnp.matmul(xq, wq.T, precision=hp).reshape(B, Sq, num_heads, dk).transpose(0, 2, 1, 3)
    K = jnp.matmul(xkv, wk.T, precision=hp).reshape(B, Sk, num_heads, dk).transpose(0, 2, 1, 3)
    V = jnp.matmul(xkv, wv.T, precision=hp).reshape(B, Sk, num_heads, dk).transpose(0, 2, 1, 3)
    s = jnp.matmul(Q, jnp.swapaxes(K, -1, -2), precision=hp) / math.sqrt(dk)
    if mask is not None:
        s = jnp.where(jnp.broadcast_to(mask, s.shape) == 0, -1e9, s)
    p = jax.nn.softmax(s, axis=-1)
    o = jnp.matmul(p, V, precision=hp).transpose(0, 2, 1, 3).reshape(B, Sq, D)
    return jnp.matmul(o, wo.T, precision=hp)


def _ref_ln(x, g, b, eps=1e-5):
    mu = x.mean(-1, keepdims=True)
    var = ((x - mu) ** 2).mean(-1, keepdims=True)
    return (x - mu) * jax.lax.rsqrt(var + eps) * g + b


def _ref_decoder(x, enc, p, num_heads, la_mask, pad_mask):
    hp = jax.lax.Precision.HIGHEST
    attn1 = _ref_mha(x, x, p["wq1"], p["wk1"], p["wv1"], p["wo1"], num_heads, la_mask)
    out1 = _ref_ln(x + attn1, p["ln1_g"], p["ln1_b"])
    attn2 = _ref_mha(out1, enc, p["wq2"], p["wk2"], p["wv2"], p["wo2"], num_heads, pad_mask)
    out2 = _ref_ln(out1 + attn2, p["ln2_g"], p["ln2_b"])
    h = jnp.maximum(jnp.matmul(out2, p["ffn_w1"].T, precision=hp) + p["ffn_b1"], 0.0)
    ffn = jnp.matmul(h, p["ffn_w2"].T, precision=hp) + p["ffn_b2"]
    return _ref_ln(out2 + ffn, p["ln3_g"], p["ln3_b"])


# ----------------------------------------------------------------------------
# demo / correctness check
# ----------------------------------------------------------------------------
if __name__ == "__main__":
    batch, seq, d_model, num_heads, dff = 2, 8, 32, 4, 64

    key = jax.random.PRNGKey(0)
    ks = jax.random.split(key, 20)

    def lin_w(k, fan_out, fan_in):
        bound = 1.0 / math.sqrt(fan_in)
        return jax.random.uniform(k, (fan_out, fan_in), jnp.float32, -bound, bound)

    def lin_b(k, fan_out, fan_in):
        bound = 1.0 / math.sqrt(fan_in)
        return jax.random.uniform(k, (fan_out,), jnp.float32, -bound, bound)

    params = {
        "wq1": lin_w(ks[0], d_model, d_model),
        "wk1": lin_w(ks[1], d_model, d_model),
        "wv1": lin_w(ks[2], d_model, d_model),
        "wo1": lin_w(ks[3], d_model, d_model),
        "wq2": lin_w(ks[4], d_model, d_model),
        "wk2": lin_w(ks[5], d_model, d_model),
        "wv2": lin_w(ks[6], d_model, d_model),
        "wo2": lin_w(ks[7], d_model, d_model),
        "ffn_w1": lin_w(ks[8], dff, d_model),
        "ffn_b1": lin_b(ks[9], dff, d_model),
        "ffn_w2": lin_w(ks[10], d_model, dff),
        "ffn_b2": lin_b(ks[11], d_model, dff),
        "ln1_g": 1.0 + 0.1 * jax.random.normal(ks[12], (d_model,), jnp.float32),
        "ln1_b": 0.1 * jax.random.normal(ks[13], (d_model,), jnp.float32),
        "ln2_g": 1.0 + 0.1 * jax.random.normal(ks[14], (d_model,), jnp.float32),
        "ln2_b": 0.1 * jax.random.normal(ks[15], (d_model,), jnp.float32),
        "ln3_g": 1.0 + 0.1 * jax.random.normal(ks[16], (d_model,), jnp.float32),
        "ln3_b": 0.1 * jax.random.normal(ks[17], (d_model,), jnp.float32),
    }

    x = jax.random.normal(ks[18], (batch, seq, d_model), jnp.float32)
    enc_output = jax.random.normal(ks[19], (batch, seq, d_model), jnp.float32)

    # Causal (look-ahead) mask: 1 = attend, 0 = masked.
    look_ahead_mask = jnp.tril(jnp.ones((seq, seq), jnp.float32))[None, None]
    padding_mask = None

    out = decoder_layer(x, enc_output, params, num_heads,
                        look_ahead_mask=look_ahead_mask,
                        padding_mask=padding_mask)
    out = jax.block_until_ready(out)

    ref = _ref_decoder(x, enc_output, params, num_heads,
                       look_ahead_mask, padding_mask)

    assert out.shape == (batch, seq, d_model)
    err = float(jnp.max(jnp.abs(out - ref)))
    assert jnp.allclose(out, ref, atol=2e-4, rtol=2e-4), err

    print("KERNEL_OK")
</pallas_src>

<mosaic_0001>
module attributes {stable_mosaic.version = 11 : i64} {
  func.func @_linear_nobias_kernel(%arg0: i32, %arg1: memref<16x32xf32, #tpu.memory_space<vmem>>, %arg2: memref<32x32xf32, #tpu.memory_space<vmem>>, %arg3: memref<16x32xf32, #tpu.memory_space<vmem>>) attributes {dimension_semantics = [#tpu.dimension_semantics<parallel>], iteration_bounds = array<i64: 1>, scalar_prefetch = 0 : i64, scratch_operands = 0 : i64, tpu.core_type = #tpu.core_type<tc>, window_params = [{transform_indices = @transform_0, window_bounds = array<i64: 16, 32>}, {pipeline_mode = #tpu.pipeline_mode<synchronous>, transform_indices = @transform_1, window_bounds = array<i64: 32, 32>}, {transform_indices = @transform_2, window_bounds = array<i64: 16, 32>}]} {
    %c0 = arith.constant 0 : index
    %c0_0 = arith.constant 0 : index
    %0 = vector.load %arg1[%c0, %c0_0] : memref<16x32xf32, #tpu.memory_space<vmem>>, vector<16x32xf32>
    %c0_1 = arith.constant 0 : index
    %c0_2 = arith.constant 0 : index
    %1 = vector.load %arg2[%c0_1, %c0_2] : memref<32x32xf32, #tpu.memory_space<vmem>>, vector<32x32xf32>
    %cst = arith.constant dense<0.000000e+00> : vector<16x32xf32>
    %2 = tpu.matmul %0, %1, %cst {dimension_numbers = #tpu.dot_dimension_numbers<[1], [1], [0], [0], [0, 0, 1, 0], [], []>} : vector<16x32xf32>, vector<32x32xf32>, vector<16x32xf32> -> vector<16x32xf32>
    %c0_3 = arith.constant 0 : index
    %c0_4 = arith.constant 0 : index
    %3 = vector.load %arg3[%c0_3, %c0_4] : memref<16x32xf32, #tpu.memory_space<vmem>>, vector<16x32xf32>
    tpu.vector_store %arg3[%c0_3, %c0_4], %2 {strides = array<i32>} : memref<16x32xf32, #tpu.memory_space<vmem>>, vector<16x32xf32>,
    return
  }
  func.func @transform_0(%arg0: i32) -> (i32, i32) {
    %c0_i32 = arith.constant 0 : i32
    %c0_i32_0 = arith.constant 0 : i32
    return %arg0, %c0_i32 : i32, i32
  }
  func.func @transform_1(%arg0: i32) -> (i32, i32) {
    %c0_i32 = arith.constant 0 : i32
    %c0_i32_0 = arith.constant 0 : i32
    %c0_i32_1 = arith.constant 0 : i32
    return %c0_i32, %c0_i32_0 : i32, i32
  }
  func.func @transform_2(%arg0: i32) -> (i32, i32) {
    %c0_i32 = arith.constant 0 : i32
    %c0_i32_0 = arith.constant 0 : i32
    return %arg0, %c0_i32 : i32, i32
  }
}

</mosaic_0001>

<bundles_post_ra>
// kernel: tpu_custom_call.1
= control target key start
LH: loop header
LB: loop body
LE: loop exit
PB: predicated region body
PF: predicated region fallthrough
CT: control target
= control target key end

     0   :  { %7 = vsyncpa [#allocation3], 0  ;;  %s343_s0 = inlined_call_operand.hbm [shape: f32[16,32], index: 0, kind: input, shape index: {}]   ;;  %s344_s1 = inlined_call_operand.hbm [shape: f32[32,32], index: 1, kind: input, shape index: {}]   ;;  %s345_s2 = inlined_call_operand.hbm [shape: f32[16,32], index: 2, kind: output, shape index: {}]  }
   0x1   :  { %8 = vsyncpa [#allocation6], 0 }
   0x2   :  { %9 = vsyncpa [#allocation4], 0  ;;  %s272_s9 = smov [#allocation2]   ;;  %s200_s13 = scalar_lea.hbm %s343_s0, 256 }
   0x3   :  { %s15_s10 = sshll.u32 %s272_s9, 4  ;;  %p201_p0 = scmp.ne.s32.totalorder %s343_s0, %s200_s13  ;;  %s16_s10 = int_to_ptr.vmem [resolvable:$true] %s15_s10 }
   0x4   :  { %p204_p1 = scmp.lt.u32.totalorder %s200_s13, %s343_s0 }
   0x6   :  { %p206_p2 = pnand %p204_p1, %p201_p0 }
   0x8   :  { %209 = shalt.err (!%p206_p2)
}
   0x9   :  { %s210_s18 = scalar_lea.vmem %s16_s10, 256  ;;  %p215_p4 = scmp.lt.s32.totalorder %s16_s10, %s16_s10 }
   0xa   :  { %p211_p3 = scmp.ne.s32.totalorder %s16_s10, %s210_s18  ;;  %p216_p5 = scmp.lt.s32.totalorder %s210_s18, %s210_s18 }
   0xc   :  { %p217_p6 = por %p216_p5, %p215_p4 }
   0xe   :  { %p218_p7 = pnand %p217_p6, %p211_p3 }
  0x10   :  { %221 = shalt.err (!%p218_p7)
}
  0x11   :  { %s273_s19 = smov 128   ;;  %s274_s20 = smov 8  }
  0x12   :  { %21 = dma.hbm_to_vmem [thread:$0]  %s343_s0, 256, %s16_s10, [#allocation3], %s273_s19, %s273_s19, %s274_s20  }
  0x13   :  { %s275_s23 = smov [#allocation5]   ;;  %s222_s27 = scalar_lea.hbm %s344_s1, 512 }
  0x14   :  { %s27_s24 = sshll.u32 %s275_s23, 4  ;;  %p223_p8 = scmp.ne.s32.totalorder %s344_s1, %s222_s27  ;;  %s28_s24 = int_to_ptr.vmem [resolvable:$true] %s27_s24 }
  0x15   :  { %p226_p9 = scmp.lt.u32.totalorder %s222_s27, %s344_s1 }
  0x17   :  { %p228_p10 = pnand %p226_p9, %p223_p8 }
  0x19   :  { %231 = shalt.err (!%p228_p10)
}
  0x1a   :  { %s232_s4 = scalar_lea.vmem %s28_s24, 512  ;;  %p237_p12 = scmp.lt.s32.totalorder %s28_s24, %s28_s24 }
  0x1b   :  { %p233_p11 = scmp.ne.s32.totalorder %s28_s24, %s232_s4  ;;  %p238_p13 = scmp.lt.s32.totalorder %s232_s4, %s232_s4 }
  0x1d   :  { %p239_p0 = por %p238_p13, %p237_p12 }
  0x1f   :  { %p240_p1 = pnand %p239_p0, %p233_p11 }
  0x21   :  { %243 = shalt.err (!%p240_p1)
}
  0x22   :  { %33 = dma.hbm_to_vmem [thread:$0]  %s344_s1, 512, %s28_s24, [#allocation6], %s273_s19, %s273_s19, %s274_s20  }
  0x23   :  { %266 = dma.done.wait [#allocation3], 256  }
  0x24   :  { %267 = vsyncadd [#allocation3], 4294967040 }
  0x25   :  { %268 = dma.done.wait [#allocation6], 512  }
  0x26   :  { %269 = vsyncadd [#allocation6], 4294966784  ;;  %vm46_vm0 = vcmask 261120   ;;  %v42_v0 = vld [vmem:[#allocation5] sm:$0xff]  ;;  %v43_v1 = vld [vmem:[#allocation5 + $0x8] sm:$0xff]  ;;  %s276_s1 = smov [#allocation7]  }
  0x27   :  { %vm184_vm1 = vmpackc.low %vm46_vm0, %vm46_vm0  ;;  %v44_v2 = vld [vmem:[#allocation5 + $0x10] sm:$0xff]  ;;  %v183_v3 = vpack.c.bf16 %v43_v1, %v42_v0  ;;  %v45_v4 = vld [vmem:[#allocation5 + $0x18] sm:$0xff]  ;;  %s147_s6 = sshll.u32 %s276_s1, 4  ;;  %s148_s6 = int_to_ptr.vmem [resolvable:$true] %s147_s6 }
  0x28   :  { %v40_v5 = vld [vmem:[#allocation2] sm:$0xff]  ;;  %v189_v6 = vpack.c.bf16 %v45_v4, %v44_v2  ;;  %v41_v7 = vld [vmem:[#allocation2 + $0x8] sm:$0xff]  ;;  %s244_s7 = scalar_lea.vmem %s148_s6, 256  ;;  %p249_p3 = scmp.lt.s32.totalorder %s148_s6, %s148_s6 }
  0x29   :  { %180 = vmatprep.mubr.msk.f32.mxu0 %vm46_vm0, %v40_v5  ;;  %185 = vmatprep.subr.msk.bf16.mxu0 %vm184_vm1, %v183_v3  ;;  %p245_p2 = scmp.ne.s32.totalorder %s148_s6, %s244_s7  ;;  %p250_p4 = scmp.lt.s32.totalorder %s244_s7, %s244_s7 }
  0x2a   :  { %188 = vmatpush3.bf16.xpose.msk.msra.mxu0 %vm184_vm1, %v183_v3 }
  0x2b   :  { %191 = vmatprep.subr.msk.bf16.mxu0 %vm184_vm1, %v189_v6  ;;  %p251_p5 = por %p250_p4, %p249_p3 }
  0x2d   :  { %p252_p6 = pnand %p251_p5, %p245_p2 }
  0x32   :  { %194 = vmatpush3.bf16.xpose.msk.msra.mxu0 %vm184_vm1, %v189_v6 }
  0x39   :  { %181 = vmatmul.mubr.msk.f32.vlgmr.msra.gmra.mrb[0].mxu0 %vm46_vm0, %v41_v7 }
 0x10c   :  { %v182_v8 = vpop.f32.mrb[0].mxu0 }
 0x10d   :  { %141 = vst.msk [vmem:[#allocation7 + $0x8] sm:$0xff] %vm46_vm0, %v182_v8  ;;  %v131_v9 = vpop.f32.mrb[1].mxu0 }
 0x10e   :  { %140 = vst.msk [vmem:[#allocation7] sm:$0xff] %vm46_vm0, %v131_v9 }
 0x10f   :  { %255 = shalt.err (!%p252_p6)
}
 0x110   :  { %s256_s10 = scalar_lea.hbm %s345_s2, 256 }
 0x111   :  { %p257_p7 = scmp.ne.s32.totalorder %s345_s2, %s256_s10  ;;  %p260_p8 = scmp.lt.u32.totalorder %s256_s10, %s345_s2 }
 0x113   :  { %p262_p9 = pnand %p260_p8, %p257_p7 }
 0x115   :  { %265 = shalt.err (!%p262_p9)
}
 0x116   :  { %153 = dma.vmem_to_hbm [thread:$0]  %s148_s6, 256, %s345_s2, [#allocation4], %s273_s19, %s273_s19, %s274_s20  }
 0x117   :  { %270 = dma.done.wait [#allocation4], 256  }
 0x118   :  { %271 = vsyncadd [#allocation4], 4294967040 }
 0x119   :  { %157 = vsyncpa [#allocation3], 1 }
 0x11a   :  { %158 = vsyncpa [#allocation6], 1 }
 0x11b   :  { %159 = vsyncpa [#allocation4], 1 }

</bundles_post_ra>
